<compile_context>
chip_gen: v6e
topology: v6e:2x2x1
jax: 0.10.0
libtpu: 0.0.40
codegen_flags: <defaults>
</compile_context>

<pallas_src>
import functools

import jax
import jax.numpy as jnp
from jax.experimental import pallas as pl
from jax.experimental.pallas import tpu as pltpu

IN_FEATURES = 22
OUT_FEATURES = 1
# >=512-row tiles reach ~85% of HBM roofline; 2048 amortizes the ~0.35us/step
# overhead while keeping the per-step VMEM footprint (~4 MiB double-buffered)
# far below v7x's 32 MiB default scoped limit (and v5e/v6e's 128 MiB).
DEFAULT_TILE_B = 2048


def linear_kernel(x_ref, w_ref, b_ref, o_ref):
    # x_ref: (TILE_B, 22) VMEM    w_ref: (1, 22) VMEM (resident across steps)
    # b_ref: (1, 1) SMEM scalar   o_ref: (TILE_B, 1) VMEM
    x = x_ref[...]
    w = w_ref[...]                                  # broadcasts over rows
    # VPU multiply + cheap lane reduce; both slots are otherwise idle in this
    # mem-bound kernel, so compute hides entirely under the DMA stream.
    acc = jnp.sum(x * w, axis=-1, keepdims=True)    # (TILE_B, 1) f32
    o_ref[...] = acc + b_ref[0, 0]


@functools.partial(jax.jit, static_argnames=("tile_b",))
def simple_model_forward(x, weight, bias, *, tile_b=DEFAULT_TILE_B):
    """x: (B, 22) f32; weight: (1, 22) f32 (PyTorch layout); bias: (1,) f32."""
    B = x.shape[0]
    # Tile size: multiple of 8 (sublane granularity), clamped for small batches.
    tile_b = min(tile_b, pl.cdiv(B, 8) * 8)
    n_tiles = pl.cdiv(B, tile_b)
    b_pad = n_tiles * tile_b
    if b_pad != B:
        x = jnp.pad(x, ((0, b_pad - B), (0, 0)))

    b2d = bias.reshape(1, 1)            # scalar, lives in SMEM

    cost = pl.CostEstimate(
        flops=2 * b_pad * IN_FEATURES,
        transcendentals=0,
        bytes_accessed=(b_pad * IN_FEATURES + b_pad * OUT_FEATURES
                        + IN_FEATURES + 1) * 4,
    )

    out = pl.pallas_call(
        linear_kernel,
        out_shape=jax.ShapeDtypeStruct((b_pad, OUT_FEATURES), jnp.float32),
        grid=(n_tiles,),
        in_specs=[
            pl.BlockSpec((tile_b, IN_FEATURES), lambda i: (i, 0)),   # x tile (streamed)
            pl.BlockSpec((1, IN_FEATURES), lambda i: (0, 0)),        # weight (resident)
            pl.BlockSpec(memory_space=pltpu.SMEM),                   # bias scalar
        ],
        out_specs=pl.BlockSpec((tile_b, OUT_FEATURES), lambda i: (i, 0)),
        compiler_params=pltpu.CompilerParams(
            dimension_semantics=("parallel",)),
        cost_estimate=cost,
    )(x, weight, b2d)
    return out[:B]


if __name__ == "__main__":
    key = jax.random.PRNGKey(0)
    kx, kw, kb = jax.random.split(key, 3)

    B = 13  # deliberately not a multiple of 8 to exercise the padding path
    x = jax.random.normal(kx, (B, IN_FEATURES), dtype=jnp.float32)

    # Deterministic init mirroring nn.Linear's uniform(-1/sqrt(fan_in), 1/sqrt(fan_in))
    bound = 1.0 / (IN_FEATURES ** 0.5)
    weight = jax.random.uniform(kw, (OUT_FEATURES, IN_FEATURES),
                                minval=-bound, maxval=bound, dtype=jnp.float32)
    bias = jax.random.uniform(kb, (OUT_FEATURES,),
                              minval=-bound, maxval=bound, dtype=jnp.float32)

    y = simple_model_forward(x, weight, bias)
    jax.block_until_ready(y)

    # Reference check against plain JAX (same math as torch.nn.Linear)
    y_ref = x @ weight.T + bias
    assert y.shape == (B, OUT_FEATURES)
    assert jnp.allclose(y, y_ref, atol=1e-5, rtol=1e-5)

    print("KERNEL_OK")
</pallas_src>

<mosaic_0001>
module attributes {stable_mosaic.version = 11 : i64} {
  func.func @linear_kernel(%arg0: i32, %arg1: memref<16x22xf32, #tpu.memory_space<vmem>>, %arg2: memref<1x22xf32, #tpu.memory_space<vmem>>, %arg3: memref<1x1xf32, #tpu.memory_space<smem>>, %arg4: memref<16x1xf32, #tpu.memory_space<vmem>>) attributes {dimension_semantics = [#tpu.dimension_semantics<parallel>], iteration_bounds = array<i64: 1>, scalar_prefetch = 0 : i64, scratch_operands = 0 : i64, tpu.core_type = #tpu.core_type<tc>, window_params = [{transform_indices = @transform_0, window_bounds = array<i64: 16, 22>}, {pipeline_mode = #tpu.pipeline_mode<synchronous>, transform_indices = @transform_1, window_bounds = array<i64: 1, 22>}, {transform_indices = @transform_2, window_bounds = array<i64: 1, 1>}, {transform_indices = @transform_3, window_bounds = array<i64: 16, 1>}]} {
    %c0 = arith.constant 0 : index
    %c0_0 = arith.constant 0 : index
    %0 = vector.load %arg1[%c0, %c0_0] : memref<16x22xf32, #tpu.memory_space<vmem>>, vector<16x22xf32>
    %c0_1 = arith.constant 0 : index
    %c0_2 = arith.constant 0 : index
    %1 = vector.load %arg2[%c0_1, %c0_2] : memref<1x22xf32, #tpu.memory_space<vmem>>, vector<1x22xf32>
    %2 = vector.broadcast %1 : vector<1x22xf32> to vector<16x22xf32>
    %3 = arith.mulf %0, %2 : vector<16x22xf32>
    %cst = arith.constant dense<0.000000e+00> : vector<16xf32>
    %4 = vector.multi_reduction <add>, %3, %cst [1] : vector<16x22xf32> to vector<16xf32>
    %5 = vector.shape_cast %4 : vector<16xf32> to vector<16x1xf32>
    %c0_3 = arith.constant 0 : index
    %c0_4 = arith.constant 0 : index
    %6 = memref.load %arg3[%c0_3, %c0_4] : memref<1x1xf32, #tpu.memory_space<smem>>
    %7 = vector.broadcast %6 : f32 to vector<16x1xf32>
    %8 = arith.addf %5, %7 : vector<16x1xf32>
    %c0_5 = arith.constant 0 : index
    %c0_6 = arith.constant 0 : index
    %9 = vector.load %arg4[%c0_5, %c0_6] : memref<16x1xf32, #tpu.memory_space<vmem>>, vector<16x1xf32>
    tpu.vector_store %arg4[%c0_5, %c0_6], %8 {strides = array<i32>} : memref<16x1xf32, #tpu.memory_space<vmem>>, vector<16x1xf32>,
    return
  }
  func.func @transform_0(%arg0: i32) -> (i32, i32) {
    %c0_i32 = arith.constant 0 : i32
    %c0_i32_0 = arith.constant 0 : i32
    return %arg0, %c0_i32 : i32, i32
  }
  func.func @transform_1(%arg0: i32) -> (i32, i32) {
    %c0_i32 = arith.constant 0 : i32
    %c0_i32_0 = arith.constant 0 : i32
    %c0_i32_1 = arith.constant 0 : i32
    return %c0_i32, %c0_i32_0 : i32, i32
  }
  func.func @transform_2(%arg0: i32) -> (i32, i32) {
    %c0_i32 = arith.constant 0 : i32
    %c0_i32_0 = arith.constant 0 : i32
    %c0_i32_1 = arith.constant 0 : i32
    return %c0_i32, %c0_i32_0 : i32, i32
  }
  func.func @transform_3(%arg0: i32) -> (i32, i32) {
    %c0_i32 = arith.constant 0 : i32
    %c0_i32_0 = arith.constant 0 : i32
    return %arg0, %c0_i32 : i32, i32
  }
}

</mosaic_0001>

<bundles_post_ra>
// kernel: simple_model_forward.1
= control target key start
LH: loop header
LB: loop body
LE: loop exit
PB: predicated region body
PF: predicated region fallthrough
CT: control target
= control target key end

     0   :  { %vm26_vm0 = vcmask 179200   ;;  %vm37_vm1 = vcmask 7168   ;;  %s83_s0 = inlined_call_operand.vmem [shape: f32[16,22], index: 0, kind: input, shape index: {}]   ;;  %s84_s1 = inlined_call_operand.vmem [shape: f32[1,22], index: 1, kind: input, shape index: {}]   ;;  %s85_s2 = inlined_call_operand.<no memory space> [shape: f32[1,1], index: 2, kind: input, shape index: {}]   ;;  %s86_s3 = inlined_call_operand.vmem [shape: f32[16,1], index: 3, kind: output, shape index: {}]  }
   0x1   :  { %v15_v0 = vld [vmem:[%s83_s0] sm:$0xff]  ;;  %v16_v2 = vld [vmem:[%s83_s0 + $0x8] sm:$0xff]  ;;  %v34_v7 = vstv %s85_s2 }
   0x2   :  { %v44_v1 = vld [vmem:[%s84_s1] ss:$0 sm:$0xff] }
   0x3   :  { %v24_v3 = vmul.f32 %v44_v1, %v15_v0  ;;  %v25_v4 = vmul.f32 %v44_v1, %v16_v2 }
   0x5   :  { %v27_v5 = vsel %vm26_vm0, %v24_v3, 0.0  ;;  %v30_v6 = vsel %vm26_vm0, %v25_v4, 0.0 }
   0x6   :  { %28 = vadd.xlane.f32.xlu0 %v27_v5 }
   0xa   :  { %31 = vadd.xlane.f32.xlu0 %v30_v6 }
  0x8f   :  { %v29_v8 = vpop.xlane.xlu0 %28 }
  0x90   :  { %v35_v9 = vadd.f32 %v34_v7, %v29_v8 }
  0x92   :  { %38 = vst.msk [vmem:[%s86_s3] sm:$0xff] %vm37_vm1, %v35_v9 }
  0x93   :  { %v32_v10 = vpop.xlane.xlu0 %31 }
  0x94   :  { %v36_v11 = vadd.f32 %v34_v7, %v32_v10 }
  0x96   :  { %39 = vst.msk [vmem:[%s86_s3 + $0x8] sm:$0xff] %vm37_vm1, %v36_v11 }

</bundles_post_ra>
